<compile_context>
chip_gen: v5e
topology: v5e:2x2
jax: 0.10.0
libtpu: 0.0.40
codegen_flags: <defaults>
</compile_context>

<pallas_src>
import jax
import jax.numpy as jnp
from jax.experimental import pallas as pl
from jax.experimental.pallas import tpu as pltpu

BATCH = 8
ENC = 32            # input_encoding_size
RNN = 32            # rnn_size
NUM_LAYERS = 2      # num_layers (>= 2 path; see TODO in pack_params for the 1-layer variant)
GATES = 5           # 4 + use_maxout
OUT_W = 128         # lane-dense per-step output width: [h1 | fake | zero pad]
MAX_UNROLL = 8      # timesteps folded into one grid step


def _ada_att_lstm_block_kernel(
    x_ref, h0_ref, c0_ref, w2h_ref, b0_ref, wh0_ref, w1x_ref, w1h_ref, b1_ref,
    out_ref, st_ref,
):
    """One grid step == U timesteps of the 2-layer AdaAtt LSTM cell."""
    R = RNN
    U, B, _ = x_ref.shape

    # Initialize the resident carry block (which is also the final-state output)
    # from the initial state on the first grid step.  Layout: [h0, h1, c0, c1].
    @pl.when(pl.program_id(0) == 0)
    def _():
        st_ref[0] = h0_ref[0]
        st_ref[1] = h0_ref[1]
        st_ref[2] = c0_ref[0]
        st_ref[3] = c0_ref[1]

    # ---- block-level hoists (amortized over the U unrolled timesteps) ----
    # Layer-0 input projection for all U timesteps in a single MXU push.  The effective
    # bias b0_ref already contains w2h_b + v2h_b + h2h0_b + img_fc @ v2h_w.
    xz = jnp.dot(
        x_ref[...].reshape(U * B, ENC), w2h_ref[...],
        preferred_element_type=jnp.float32,
    ).reshape(U, B, GATES * R) + b0_ref[...]
    b1b = jnp.broadcast_to(b1_ref[...], (B, (GATES + 1) * R))   # hoisted bias broadcast
    pad = jnp.zeros((B, OUT_W - 2 * R), jnp.float32)            # hoisted output pad
    wh0 = wh0_ref[...]
    w1x = w1x_ref[...]
    w1h = w1h_ref[...]

    # Recurrent carry lives in registers across the unrolled steps.
    h0 = st_ref[0]
    h1 = st_ref[1]
    c0 = st_ref[2]
    c1 = st_ref[3]

    for u in range(U):   # static unroll, U <= MAX_UNROLL
        # ---- layer 0: only the recurrent h_prev0 @ h2h[0] matmul remains per step ----
        z0 = xz[u] + jnp.dot(h0, wh0, preferred_element_type=jnp.float32)
        sig0 = jax.nn.sigmoid(z0[:, 0:3 * R])
        in_t0 = jnp.maximum(z0[:, 3 * R:4 * R], z0[:, 4 * R:5 * R])   # use_maxout=True
        c0 = sig0[:, R:2 * R] * c0 + sig0[:, 0:R] * in_t0
        h0 = sig0[:, 2 * R:3 * R] * jnp.tanh(c0)

        # ---- layer 1 + fake-region branch: two split K=32 matmuls (no lane concat);
        #      cols 0:160 = LSTM gates (i2h[0]+h2h[1]), cols 160:192 = n5 (r_i2h+r_h2h).
        #      F.dropout on x = h0 is identity in eval mode. ----
        z1 = (jnp.dot(h0, w1x, preferred_element_type=jnp.float32)
              + jnp.dot(h1, w1h, preferred_element_type=jnp.float32) + b1b)
        sig1 = jax.nn.sigmoid(z1[:, 0:3 * R])
        in_t1 = jnp.maximum(z1[:, 3 * R:4 * R], z1[:, 4 * R:5 * R])
        c1 = sig1[:, R:2 * R] * c1 + sig1[:, 0:R] * in_t1
        tanh_c1 = jnp.tanh(c1)
        fake = jax.nn.sigmoid(z1[:, 5 * R:6 * R]) * tanh_c1
        h1 = sig1[:, 2 * R:3 * R] * tanh_c1

        # Lane-dense, full-vreg-width store for this timestep: [h1 | fake | zeros].
        out_ref[u] = jnp.concatenate([h1, fake, pad], axis=1)

    # Write back the carry; after the last grid step this is the final-state output.
    st_ref[0] = h0
    st_ref[1] = h1
    st_ref[2] = c0
    st_ref[3] = c1


def _pick_unroll(T, max_u=MAX_UNROLL):
    u = min(T, max_u)
    while T % u != 0:
        u -= 1
    return u


def ada_att_lstm_seq(x_seq, img_fc, state_h, state_c, packed):
    """Run the cell over a whole sequence inside one pallas_call.

    Returns (top_h_seq [T,B,R], fake_seq [T,B,R], (h_final, c_final) each [L,B,R]).
    """
    T, B, _ = x_seq.shape
    R = RNN
    U = _pick_unroll(T)

    # Timestep-invariant: fold the img_fc projection into a per-batch layer-0 bias once.
    b0_eff = img_fc @ packed["v2h_w"] + packed["b0_base"]      # [B, 5R]

    out_seq, out_state = pl.pallas_call(
        _ada_att_lstm_block_kernel,
        out_shape=(
            jax.ShapeDtypeStruct((T, B, OUT_W), jnp.float32),
            jax.ShapeDtypeStruct((2 * NUM_LAYERS, B, R), jnp.float32),
        ),
        grid_spec=pltpu.PrefetchScalarGridSpec(
            num_scalar_prefetch=0,
            grid=(T // U,),
            in_specs=[
                pl.BlockSpec((U, B, ENC), lambda b: (b, 0, 0)),               # x (streamed)
                pl.BlockSpec((NUM_LAYERS, B, R), lambda b: (0, 0, 0)),        # initial h
                pl.BlockSpec((NUM_LAYERS, B, R), lambda b: (0, 0, 0)),        # initial c
                pl.BlockSpec((ENC, GATES * R), lambda b: (0, 0)),             # w2h_w
                pl.BlockSpec((B, GATES * R), lambda b: (0, 0)),               # b0_eff [B,160]
                pl.BlockSpec((R, GATES * R), lambda b: (0, 0)),               # h2h0_w
                pl.BlockSpec((R, (GATES + 1) * R), lambda b: (0, 0)),         # [i2h1 | r_i2h]
                pl.BlockSpec((R, (GATES + 1) * R), lambda b: (0, 0)),         # [h2h1 | r_h2h]
                pl.BlockSpec((1, (GATES + 1) * R), lambda b: (0, 0)),         # b1
            ],
            out_specs=[
                pl.BlockSpec((U, B, OUT_W), lambda b: (b, 0, 0)),             # [h1|fake|pad]
                pl.BlockSpec((2 * NUM_LAYERS, B, R), lambda b: (0, 0, 0)),    # carry / final
            ],
        ),
        compiler_params=pltpu.CompilerParams(
            dimension_semantics=("arbitrary",),   # carried recurrent state -> sequential
        ),
    )(x_seq, state_h, state_c, packed["w2h_w"], b0_eff, packed["h2h0_w"],
      packed["w1x"], packed["w1h"], packed["b1"])

    top_h_seq = out_seq[:, :, 0:R]          # h1 per step (dropout identity in eval)
    fake_seq = out_seq[:, :, R:2 * R]
    h_final = out_state[0:NUM_LAYERS]
    c_final = out_state[NUM_LAYERS:2 * NUM_LAYERS]
    return top_h_seq, fake_seq, (h_final, c_final)


def ada_att_lstm(xt, img_fc, state_h, state_c, packed):
    """Single-timestep call matching the PyTorch module's forward signature."""
    top_seq, fake_seq, (h_new, c_new) = ada_att_lstm_seq(
        xt[None], img_fc, state_h, state_c, packed)
    return top_seq[0], fake_seq[0], (h_new, c_new)


# --------------------------------------------------------------------------------------
# Parameter init (PyTorch nn.Linear-style) and init-time weight packing.
# --------------------------------------------------------------------------------------

def _linear_init(key, fan_in, fan_out):
    k1, k2 = jax.random.split(key)
    bound = 1.0 / (fan_in ** 0.5)
    w = jax.random.uniform(k1, (fan_in, fan_out), jnp.float32, -bound, bound)
    b = jax.random.uniform(k2, (1, fan_out), jnp.float32, -bound, bound)
    return w, b


def init_params(key):
    ks = jax.random.split(key, 7)
    p = {}
    p["w2h_w"], p["w2h_b"] = _linear_init(ks[0], ENC, GATES * RNN)
    p["v2h_w"], p["v2h_b"] = _linear_init(ks[1], RNN, GATES * RNN)
    p["i2h1_w"], p["i2h1_b"] = _linear_init(ks[2], RNN, GATES * RNN)   # i2h[0] (layer 1)
    p["h2h0_w"], p["h2h0_b"] = _linear_init(ks[3], RNN, GATES * RNN)   # h2h[0]
    p["h2h1_w"], p["h2h1_b"] = _linear_init(ks[4], RNN, GATES * RNN)   # h2h[1]
    p["r_i2h_w"], p["r_i2h_b"] = _linear_init(ks[5], RNN, RNN)
    p["r_h2h_w"], p["r_h2h_b"] = _linear_init(ks[6], RNN, RNN)
    return p


def pack_params(p):
    """Fuse the 14 weight/bias arrays (once, at init) into the kernel layout."""
    # TODO(synk): num_layers==1 variant (r_w2h / r_v2h) and num_layers>2 not wired here.
    return {
        "w2h_w": p["w2h_w"],                                                   # [32, 160]
        "v2h_w": p["v2h_w"],                                                   # [32, 160]
        "b0_base": p["w2h_b"] + p["v2h_b"] + p["h2h0_b"],                      # [1, 160]
        "h2h0_w": p["h2h0_w"],                                                 # [32, 160]
        "w1x": jnp.concatenate([p["i2h1_w"], p["r_i2h_w"]], axis=1),           # [32, 192]
        "w1h": jnp.concatenate([p["h2h1_w"], p["r_h2h_w"]], axis=1),           # [32, 192]
        "b1": jnp.concatenate(
            [p["i2h1_b"] + p["h2h1_b"], p["r_i2h_b"] + p["r_h2h_b"]], axis=1), # [1, 192]
    }


# --------------------------------------------------------------------------------------
# Plain-JAX reference (mirrors the PyTorch forward in eval mode) for verification.
# --------------------------------------------------------------------------------------

def reference_forward(xt, img_fc, state_h, state_c, p):
    R = RNN
    hs, cs = [], []
    fake = None
    x = xt
    for L in range(NUM_LAYERS):
        prev_h, prev_c = state_h[L], state_c[L]
        if L == 0:
            i2h = xt @ p["w2h_w"] + p["w2h_b"] + img_fc @ p["v2h_w"] + p["v2h_b"]
            hw, hb = p["h2h0_w"], p["h2h0_b"]
        else:
            x = hs[-1]
            i2h = x @ p["i2h1_w"] + p["i2h1_b"]
            hw, hb = p["h2h1_w"], p["h2h1_b"]
        a = i2h + prev_h @ hw + hb
        sig = jax.nn.sigmoid(a[:, :3 * R])
        ig, fg, og = sig[:, :R], sig[:, R:2 * R], sig[:, 2 * R:3 * R]
        it = jnp.maximum(a[:, 3 * R:4 * R], a[:, 4 * R:5 * R])
        nc = fg * prev_c + ig * it
        tc = jnp.tanh(nc)
        nh = og * tc
        if L == NUM_LAYERS - 1:
            n5 = x @ p["r_i2h_w"] + p["r_i2h_b"] + prev_h @ p["r_h2h_w"] + p["r_h2h_b"]
            fake = jax.nn.sigmoid(n5) * tc
        hs.append(nh)
        cs.append(nc)
    return hs[-1], fake, (jnp.stack(hs, 0), jnp.stack(cs, 0))


def _check(a, b, name, atol=1e-4, rtol=1e-4):
    assert jnp.allclose(a, b, atol=atol, rtol=rtol), (
        f"{name} mismatch: max abs err {float(jnp.max(jnp.abs(a - b)))}")


if __name__ == "__main__":
    key = jax.random.PRNGKey(0)
    kx, kf, kh, kc, kp = jax.random.split(key, 5)
    T = 8
    x_seq = jax.random.normal(kx, (T, BATCH, ENC), jnp.float32)
    img_fc = jax.random.normal(kf, (BATCH, RNN), jnp.float32)
    state_h = jax.random.normal(kh, (NUM_LAYERS, BATCH, RNN), jnp.float32)
    state_c = jax.random.normal(kc, (NUM_LAYERS, BATCH, RNN), jnp.float32)
    params = init_params(kp)
    packed = pack_params(params)

    # ---- single-step call (exact module semantics) ----
    top_h, fake, (h_new, c_new) = ada_att_lstm(x_seq[0], img_fc, state_h, state_c, packed)
    jax.block_until_ready((top_h, fake, h_new, c_new))

    r_top, r_fake, (r_h, r_c) = reference_forward(x_seq[0], img_fc, state_h, state_c, params)
    _check(top_h, r_top, "top_h")
    _check(fake, r_fake, "fake_region")
    _check(h_new, r_h, "state_h")
    _check(c_new, r_c, "state_c")

    # ---- full-sequence call (time loop folded/unrolled into the kernel grid) ----
    top_seq, fake_seq, (h_T, c_T) = ada_att_lstm_seq(x_seq, img_fc, state_h, state_c, packed)
    jax.block_until_ready((top_seq, fake_seq, h_T, c_T))

    h, c = state_h, state_c
    ref_tops, ref_fakes = [], []
    for t in range(T):
        rt, rf, (h, c) = reference_forward(x_seq[t], img_fc, h, c, params)
        ref_tops.append(rt)
        ref_fakes.append(rf)
    _check(top_seq, jnp.stack(ref_tops, 0), "top_h_seq")
    _check(fake_seq, jnp.stack(ref_fakes, 0), "fake_seq")
    _check(h_T, h, "final_h")
    _check(c_T, c, "final_c")

    print("KERNEL_OK")
</pallas_src>

<mosaic_0001>
module attributes {stable_mosaic.version = 11 : i64} {
  func.func @_ada_att_lstm_block_kernel(%arg0: i32, %arg1: memref<1x8x32xf32, #tpu.memory_space<vmem>>, %arg2: memref<2x8x32xf32, #tpu.memory_space<vmem>>, %arg3: memref<2x8x32xf32, #tpu.memory_space<vmem>>, %arg4: memref<32x160xf32, #tpu.memory_space<vmem>>, %arg5: memref<8x160xf32, #tpu.memory_space<vmem>>, %arg6: memref<32x160xf32, #tpu.memory_space<vmem>>, %arg7: memref<32x192xf32, #tpu.memory_space<vmem>>, %arg8: memref<32x192xf32, #tpu.memory_space<vmem>>, %arg9: memref<1x192xf32, #tpu.memory_space<vmem>>, %arg10: memref<1x8x128xf32, #tpu.memory_space<vmem>>, %arg11: memref<4x8x32xf32, #tpu.memory_space<vmem>>) attributes {dimension_semantics = [#tpu.dimension_semantics<arbitrary>], iteration_bounds = array<i64: 1>, scalar_prefetch = 0 : i64, scratch_operands = 0 : i64, tpu.core_type = #tpu.core_type<tc>, window_params = [{transform_indices = @transform_0, window_bounds = array<i64: 1, 8, 32>}, {pipeline_mode = #tpu.pipeline_mode<synchronous>, transform_indices = @transform_1, window_bounds = array<i64: 2, 8, 32>}, {pipeline_mode = #tpu.pipeline_mode<synchronous>, transform_indices = @transform_2, window_bounds = array<i64: 2, 8, 32>}, {pipeline_mode = #tpu.pipeline_mode<synchronous>, transform_indices = @transform_3, window_bounds = array<i64: 32, 160>}, {pipeline_mode = #tpu.pipeline_mode<synchronous>, transform_indices = @transform_4, window_bounds = array<i64: 8, 160>}, {pipeline_mode = #tpu.pipeline_mode<synchronous>, transform_indices = @transform_5, window_bounds = array<i64: 32, 160>}, {pipeline_mode = #tpu.pipeline_mode<synchronous>, transform_indices = @transform_6, window_bounds = array<i64: 32, 192>}, {pipeline_mode = #tpu.pipeline_mode<synchronous>, transform_indices = @transform_7, window_bounds = array<i64: 32, 192>}, {pipeline_mode = #tpu.pipeline_mode<synchronous>, transform_indices = @transform_8, window_bounds = array<i64: 1, 192>}, {transform_indices = @transform_9, window_bounds = array<i64: 1, 8, 128>}, {pipeline_mode = #tpu.pipeline_mode<synchronous>, transform_indices = @transform_10, window_bounds = array<i64: 4, 8, 32>}]} {
    %c0_i32 = arith.constant 0 : i32
    %0 = arith.cmpi eq, %arg0, %c0_i32 : i32
    %1 = arith.extui %0 : i1 to i32
    %c0_i32_0 = arith.constant 0 : i32
    %2 = arith.cmpi ne, %1, %c0_i32_0 : i32
    scf.if %2 {
      %c0_46 = arith.constant 0 : index
      %c0_47 = arith.constant 0 : index
      %c0_48 = arith.constant 0 : index
      %90 = vector.load %arg2[%c0_46, %c0_47, %c0_48] : memref<2x8x32xf32, #tpu.memory_space<vmem>>, vector<1x8x32xf32>
      %91 = vector.shape_cast %90 : vector<1x8x32xf32> to vector<8x32xf32>
      %c0_49 = arith.constant 0 : index
      %c0_50 = arith.constant 0 : index
      %c0_51 = arith.constant 0 : index
      %92 = vector.load %arg11[%c0_49, %c0_50, %c0_51] : memref<4x8x32xf32, #tpu.memory_space<vmem>>, vector<1x8x32xf32>
      %93 = vector.shape_cast %92 : vector<1x8x32xf32> to vector<8x32xf32>
      %94 = vector.shape_cast %91 : vector<8x32xf32> to vector<1x8x32xf32>
      tpu.vector_store %arg11[%c0_49, %c0_50, %c0_51], %94 {strides = array<i32>} : memref<4x8x32xf32, #tpu.memory_space<vmem>>, vector<1x8x32xf32>,
      %c1_52 = arith.constant 1 : index
      %c0_53 = arith.constant 0 : index
      %c0_54 = arith.constant 0 : index
      %95 = vector.load %arg2[%c1_52, %c0_53, %c0_54] : memref<2x8x32xf32, #tpu.memory_space<vmem>>, vector<1x8x32xf32>
      %96 = vector.shape_cast %95 : vector<1x8x32xf32> to vector<8x32xf32>
      %c1_55 = arith.constant 1 : index
      %c0_56 = arith.constant 0 : index
      %c0_57 = arith.constant 0 : index
      %97 = vector.load %arg11[%c1_55, %c0_56, %c0_57] : memref<4x8x32xf32, #tpu.memory_space<vmem>>, vector<1x8x32xf32>
      %98 = vector.shape_cast %97 : vector<1x8x32xf32> to vector<8x32xf32>
      %99 = vector.shape_cast %96 : vector<8x32xf32> to vector<1x8x32xf32>
      tpu.vector_store %arg11[%c1_55, %c0_56, %c0_57], %99 {strides = array<i32>} : memref<4x8x32xf32, #tpu.memory_space<vmem>>, vector<1x8x32xf32>,
      %c0_58 = arith.constant 0 : index
      %c0_59 = arith.constant 0 : index
      %c0_60 = arith.constant 0 : index
      %100 = vector.load %arg3[%c0_58, %c0_59, %c0_60] : memref<2x8x32xf32, #tpu.memory_space<vmem>>, vector<1x8x32xf32>
      %101 = vector.shape_cast %100 : vector<1x8x32xf32> to vector<8x32xf32>
      %c2_61 = arith.constant 2 : index
      %c0_62 = arith.constant 0 : index
      %c0_63 = arith.constant 0 : index
      %102 = vector.load %arg11[%c2_61, %c0_62, %c0_63] : memref<4x8x32xf32, #tpu.memory_space<vmem>>, vector<1x8x32xf32>
      %103 = vector.shape_cast %102 : vector<1x8x32xf32> to vector<8x32xf32>
      %104 = vector.shape_cast %101 : vector<8x32xf32> to vector<1x8x32xf32>
      tpu.vector_store %arg11[%c2_61, %c0_62, %c0_63], %104 {strides = array<i32>} : memref<4x8x32xf32, #tpu.memory_space<vmem>>, vector<1x8x32xf32>,
      %c1_64 = arith.constant 1 : index
      %c0_65 = arith.constant 0 : index
      %c0_66 = arith.constant 0 : index
      %105 = vector.load %arg3[%c1_64, %c0_65, %c0_66] : memref<2x8x32xf32, #tpu.memory_space<vmem>>, vector<1x8x32xf32>
      %106 = vector.shape_cast %105 : vector<1x8x32xf32> to vector<8x32xf32>
      %c3_67 = arith.constant 3 : index
      %c0_68 = arith.constant 0 : index
      %c0_69 = arith.constant 0 : index
      %107 = vector.load %arg11[%c3_67, %c0_68, %c0_69] : memref<4x8x32xf32, #tpu.memory_space<vmem>>, vector<1x8x32xf32>
      %108 = vector.shape_cast %107 : vector<1x8x32xf32> to vector<8x32xf32>
      %109 = vector.shape_cast %106 : vector<8x32xf32> to vector<1x8x32xf32>
      tpu.vector_store %arg11[%c3_67, %c0_68, %c0_69], %109 {strides = array<i32>} : memref<4x8x32xf32, #tpu.memory_space<vmem>>, vector<1x8x32xf32>,
    } else {
    }
    %c0 = arith.constant 0 : index
    %c0_1 = arith.constant 0 : index
    %c0_2 = arith.constant 0 : index
    %3 = vector.load %arg1[%c0, %c0_1, %c0_2] : memref<1x8x32xf32, #tpu.memory_space<vmem>>, vector<1x8x32xf32>
    %4 = vector.shape_cast %3 : vector<1x8x32xf32> to vector<8x32xf32>
    %c0_3 = arith.constant 0 : index
    %c0_4 = arith.constant 0 : index
    %5 = vector.load %arg4[%c0_3, %c0_4] : memref<32x160xf32, #tpu.memory_space<vmem>>, vector<32x160xf32>
    %cst = arith.constant dense<0.000000e+00> : vector<8x160xf32>
    %6 = tpu.matmul %4, %5, %cst {dimension_numbers = #tpu.dot_dimension_numbers<[1], [0], [0], [1], [0, 0, 1, 1], [], []>} : vector<8x32xf32>, vector<32x160xf32>, vector<8x160xf32> -> vector<8x160xf32>
    %7 = vector.shape_cast %6 : vector<8x160xf32> to vector<1x8x160xf32>
    %c0_5 = arith.constant 0 : index
    %c0_6 = arith.constant 0 : index
    %8 = vector.load %arg5[%c0_5, %c0_6] : memref<8x160xf32, #tpu.memory_space<vmem>>, vector<8x160xf32>
    %9 = vector.shape_cast %8 : vector<8x160xf32> to vector<1x8x160xf32>
    %10 = arith.addf %7, %9 : vector<1x8x160xf32>
    %c0_7 = arith.constant 0 : index
    %c0_8 = arith.constant 0 : index
    %11 = vector.load %arg9[%c0_7, %c0_8] : memref<1x192xf32, #tpu.memory_space<vmem>>, vector<1x192xf32>
    %12 = vector.shape_cast %11 : vector<1x192xf32> to vector<1x192xf32>
    %13 = vector.broadcast %12 : vector<1x192xf32> to vector<8x192xf32>
    %cst_9 = arith.constant 0.000000e+00 : f32
    %14 = vector.broadcast %cst_9 : f32 to vector<8x64xf32>
    %c0_10 = arith.constant 0 : index
    %c0_11 = arith.constant 0 : index
    %15 = vector.load %arg6[%c0_10, %c0_11] : memref<32x160xf32, #tpu.memory_space<vmem>>, vector<32x160xf32>
    %c0_12 = arith.constant 0 : index
    %c0_13 = arith.constant 0 : index
    %16 = vector.load %arg7[%c0_12, %c0_13] : memref<32x192xf32, #tpu.memory_space<vmem>>, vector<32x192xf32>
    %c0_14 = arith.constant 0 : index
    %c0_15 = arith.constant 0 : index
    %17 = vector.load %arg8[%c0_14, %c0_15] : memref<32x192xf32, #tpu.memory_space<vmem>>, vector<32x192xf32>
    %c0_16 = arith.constant 0 : index
    %c0_17 = arith.constant 0 : index
    %c0_18 = arith.constant 0 : index
    %18 = vector.load %arg11[%c0_16, %c0_17, %c0_18] : memref<4x8x32xf32, #tpu.memory_space<vmem>>, vector<1x8x32xf32>
    %19 = vector.shape_cast %18 : vector<1x8x32xf32> to vector<8x32xf32>
    %c1 = arith.constant 1 : index
    %c0_19 = arith.constant 0 : index
    %c0_20 = arith.constant 0 : index
    %20 = vector.load %arg11[%c1, %c0_19, %c0_20] : memref<4x8x32xf32, #tpu.memory_space<vmem>>, vector<1x8x32xf32>
    %21 = vector.shape_cast %20 : vector<1x8x32xf32> to vector<8x32xf32>
    %c2 = arith.constant 2 : index
    %c0_21 = arith.constant 0 : index
    %c0_22 = arith.constant 0 : index
    %22 = vector.load %arg11[%c2, %c0_21, %c0_22] : memref<4x8x32xf32, #tpu.memory_space<vmem>>, vector<1x8x32xf32>
    %23 = vector.shape_cast %22 : vector<1x8x32xf32> to vector<8x32xf32>
    %c3 = arith.constant 3 : index
    %c0_23 = arith.constant 0 : index
    %c0_24 = arith.constant 0 : index
    %24 = vector.load %arg11[%c3, %c0_23, %c0_24] : memref<4x8x32xf32, #tpu.memory_space<vmem>>, vector<1x8x32xf32>
    %25 = vector.shape_cast %24 : vector<1x8x32xf32> to vector<8x32xf32>
    %26 = vector.shape_cast %10 : vector<1x8x160xf32> to vector<8x160xf32>
    %cst_25 = arith.constant dense<0.000000e+00> : vector<8x160xf32>
    %27 = tpu.matmul %19, %15, %cst_25 {dimension_numbers = #tpu.dot_dimension_numbers<[1], [0], [0], [1], [0, 0, 1, 1], [], []>} : vector<8x32xf32>, vector<32x160xf32>, vector<8x160xf32> -> vector<8x160xf32>
    %28 = arith.addf %26, %27 : vector<8x160xf32>
    %29 = vector.extract_strided_slice %28 {offsets = [0, 0], sizes = [8, 96], strides = [1, 1]} : vector<8x160xf32> to vector<8x96xf32>
    %30 = arith.negf %29 : vector<8x96xf32>
    %31 = math.exp %30 : vector<8x96xf32>
    %cst_26 = arith.constant 1.000000e+00 : f32
    %32 = vector.broadcast %cst_26 : f32 to vector<8x96xf32>
    %33 = arith.addf %32, %31 : vector<8x96xf32>
    %34 = arith.divf %32, %33 : vector<8x96xf32>
    %35 = vector.extract_strided_slice %28 {offsets = [0, 96], sizes = [8, 32], strides = [1, 1]} : vector<8x160xf32> to vector<8x32xf32>
    %36 = vector.extract_strided_slice %28 {offsets = [0, 128], sizes = [8, 32], strides = [1, 1]} : vector<8x160xf32> to vector<8x32xf32>
    %37 = arith.maximumf %35, %36 : vector<8x32xf32>
    %38 = vector.extract_strided_slice %34 {offsets = [0, 32], sizes = [8, 32], strides = [1, 1]} : vector<8x96xf32> to vector<8x32xf32>
    %39 = arith.mulf %38, %23 : vector<8x32xf32>
    %40 = vector.extract_strided_slice %34 {offsets = [0, 0], sizes = [8, 32], strides = [1, 1]} : vector<8x96xf32> to vector<8x32xf32>
    %41 = arith.mulf %40, %37 : vector<8x32xf32>
    %42 = arith.addf %39, %41 : vector<8x32xf32>
    %43 = vector.extract_strided_slice %34 {offsets = [0, 64], sizes = [8, 32], strides = [1, 1]} : vector<8x96xf32> to vector<8x32xf32>
    %44 = math.tanh %42 : vector<8x32xf32>
    %45 = arith.mulf %43, %44 : vector<8x32xf32>
    %cst_27 = arith.constant dense<0.000000e+00> : vector<8x192xf32>
    %46 = tpu.matmul %45, %16, %cst_27 {dimension_numbers = #tpu.dot_dimension_numbers<[1], [0], [0], [1], [0, 0, 1, 1], [], []>} : vector<8x32xf32>, vector<32x192xf32>, vector<8x192xf32> -> vector<8x192xf32>
    %cst_28 = arith.constant dense<0.000000e+00> : vector<8x192xf32>
    %47 = tpu.matmul %21, %17, %cst_28 {dimension_numbers = #tpu.dot_dimension_numbers<[1], [0], [0], [1], [0, 0, 1, 1], [], []>} : vector<8x32xf32>, vector<32x192xf32>, vector<8x192xf32> -> vector<8x192xf32>
    %48 = arith.addf %46, %47 : vector<8x192xf32>
    %49 = arith.addf %48, %13 : vector<8x192xf32>
    %50 = vector.extract_strided_slice %49 {offsets = [0, 0], sizes = [8, 96], strides = [1, 1]} : vector<8x192xf32> to vector<8x96xf32>
    %51 = arith.negf %50 : vector<8x96xf32>
    %52 = math.exp %51 : vector<8x96xf32>
    %cst_29 = arith.constant 1.000000e+00 : f32
    %53 = vector.broadcast %cst_29 : f32 to vector<8x96xf32>
    %54 = arith.addf %53, %52 : vector<8x96xf32>
    %55 = arith.divf %53, %54 : vector<8x96xf32>
    %56 = vector.extract_strided_slice %49 {offsets = [0, 96], sizes = [8, 32], strides = [1, 1]} : vector<8x192xf32> to vector<8x32xf32>
    %57 = vector.extract_strided_slice %49 {offsets = [0, 128], sizes = [8, 32], strides = [1, 1]} : vector<8x192xf32> to vector<8x32xf32>
    %58 = arith.maximumf %56, %57 : vector<8x32xf32>
    %59 = vector.extract_strided_slice %55 {offsets = [0, 32], sizes = [8, 32], strides = [1, 1]} : vector<8x96xf32> to vector<8x32xf32>
    %60 = arith.mulf %59, %25 : vector<8x32xf32>
    %61 = vector.extract_strided_slice %55 {offsets = [0, 0], sizes = [8, 32], strides = [1, 1]} : vector<8x96xf32> to vector<8x32xf32>
    %62 = arith.mulf %61, %58 : vector<8x32xf32>
    %63 = arith.addf %60, %62 : vector<8x32xf32>
    %64 = math.tanh %63 : vector<8x32xf32>
    %65 = vector.extract_strided_slice %49 {offsets = [0, 160], sizes = [8, 32], strides = [1, 1]} : vector<8x192xf32> to vector<8x32xf32>
    %66 = arith.negf %65 : vector<8x32xf32>
    %67 = math.exp %66 : vector<8x32xf32>
    %cst_30 = arith.constant 1.000000e+00 : f32
    %68 = vector.broadcast %cst_30 : f32 to vector<8x32xf32>
    %69 = arith.addf %68, %67 : vector<8x32xf32>
    %70 = arith.divf %68, %69 : vector<8x32xf32>
    %71 = arith.mulf %70, %64 : vector<8x32xf32>
    %72 = vector.extract_strided_slice %55 {offsets = [0, 64], sizes = [8, 32], strides = [1, 1]} : vector<8x96xf32> to vector<8x32xf32>
    %73 = arith.mulf %72, %64 : vector<8x32xf32>
    %74 = tpu.concatenate %73, %71, %14 in 1 : vector<8x32xf32>, vector<8x32xf32>, vector<8x64xf32> -> vector<8x128xf32>
    %c0_31 = arith.constant 0 : index
    %c0_32 = arith.constant 0 : index
    %c0_33 = arith.constant 0 : index
    %75 = vector.load %arg10[%c0_31, %c0_32, %c0_33] : memref<1x8x128xf32, #tpu.memory_space<vmem>>, vector<1x8x128xf32>
    %76 = vector.shape_cast %75 : vector<1x8x128xf32> to vector<8x128xf32>
    %77 = vector.shape_cast %74 : vector<8x128xf32> to vector<1x8x128xf32>
    tpu.vector_store %arg10[%c0_31, %c0_32, %c0_33], %77 {strides = array<i32>} : memref<1x8x128xf32, #tpu.memory_space<vmem>>, vector<1x8x128xf32>,
    %c0_34 = arith.constant 0 : index
    %c0_35 = arith.constant 0 : index
    %c0_36 = arith.constant 0 : index
    %78 = vector.load %arg11[%c0_34, %c0_35, %c0_36] : memref<4x8x32xf32, #tpu.memory_space<vmem>>, vector<1x8x32xf32>
    %79 = vector.shape_cast %78 : vector<1x8x32xf32> to vector<8x32xf32>
    %80 = vector.shape_cast %45 : vector<8x32xf32> to vector<1x8x32xf32>
    tpu.vector_store %arg11[%c0_34, %c0_35, %c0_36], %80 {strides = array<i32>} : memref<4x8x32xf32, #tpu.memory_space<vmem>>, vector<1x8x32xf32>,
    %c1_37 = arith.constant 1 : index
    %c0_38 = arith.constant 0 : index
    %c0_39 = arith.constant 0 : index
    %81 = vector.load %arg11[%c1_37, %c0_38, %c0_39] : memref<4x8x32xf32, #tpu.memory_space<vmem>>, vector<1x8x32xf32>
    %82 = vector.shape_cast %81 : vector<1x8x32xf32> to vector<8x32xf32>
    %83 = vector.shape_cast %73 : vector<8x32xf32> to vector<1x8x32xf32>
    tpu.vector_store %arg11[%c1_37, %c0_38, %c0_39], %83 {strides = array<i32>} : memref<4x8x32xf32, #tpu.memory_space<vmem>>, vector<1x8x32xf32>,
    %c2_40 = arith.constant 2 : index
    %c0_41 = arith.constant 0 : index
    %c0_42 = arith.constant 0 : index
    %84 = vector.load %arg11[%c2_40, %c0_41, %c0_42] : memref<4x8x32xf32, #tpu.memory_space<vmem>>, vector<1x8x32xf32>
    %85 = vector.shape_cast %84 : vector<1x8x32xf32> to vector<8x32xf32>
    %86 = vector.shape_cast %42 : vector<8x32xf32> to vector<1x8x32xf32>
    tpu.vector_store %arg11[%c2_40, %c0_41, %c0_42], %86 {strides = array<i32>} : memref<4x8x32xf32, #tpu.memory_space<vmem>>, vector<1x8x32xf32>,
    %c3_43 = arith.constant 3 : index
    %c0_44 = arith.constant 0 : index
    %c0_45 = arith.constant 0 : index
    %87 = vector.load %arg11[%c3_43, %c0_44, %c0_45] : memref<4x8x32xf32, #tpu.memory_space<vmem>>, vector<1x8x32xf32>
    %88 = vector.shape_cast %87 : vector<1x8x32xf32> to vector<8x32xf32>
    %89 = vector.shape_cast %63 : vector<8x32xf32> to vector<1x8x32xf32>
    tpu.vector_store %arg11[%c3_43, %c0_44, %c0_45], %89 {strides = array<i32>} : memref<4x8x32xf32, #tpu.memory_space<vmem>>, vector<1x8x32xf32>,
    return
  }
  func.func @transform_0(%arg0: i32) -> (i32, i32, i32) {
    %c0_i32 = arith.constant 0 : i32
    %c0_i32_0 = arith.constant 0 : i32
    %c0_i32_1 = arith.constant 0 : i32
    return %arg0, %c0_i32, %c0_i32_0 : i32, i32, i32
  }
  func.func @transform_1(%arg0: i32) -> (i32, i32, i32) {
    %c0_i32 = arith.constant 0 : i32
    %c0_i32_0 = arith.constant 0 : i32
    %c0_i32_1 = arith.constant 0 : i32
    %c0_i32_2 = arith.constant 0 : i32
    return %c0_i32, %c0_i32_0, %c0_i32_1 : i32, i32, i32
  }
  func.func @transform_2(%arg0: i32) -> (i32, i32, i32) {
    %c0_i32 = arith.constant 0 : i32
    %c0_i32_0 = arith.constant 0 : i32
    %c0_i32_1 = arith.constant 0 : i32
    %c0_i32_2 = arith.constant 0 : i32
    return %c0_i32, %c0_i32_0, %c0_i32_1 : i32, i32, i32
  }
  func.func @transform_3(%arg0: i32) -> (i32, i32) {
    %c0_i32 = arith.constant 0 : i32
    %c0_i32_0 = arith.constant 0 : i32
    %c0_i32_1 = arith.constant 0 : i32
    return %c0_i32, %c0_i32_0 : i32, i32
  }
  func.func @transform_4(%arg0: i32) -> (i32, i32) {
    %c0_i32 = arith.constant 0 : i32
    %c0_i32_0 = arith.constant 0 : i32
    %c0_i32_1 = arith.constant 0 : i32
    return %c0_i32, %c0_i32_0 : i32, i32
  }
  func.func @transform_5(%arg0: i32) -> (i32, i32) {
    %c0_i32 = arith.constant 0 : i32
    %c0_i32_0 = arith.constant 0 : i32
    %c0_i32_1 = arith.constant 0 : i32
    return %c0_i32, %c0_i32_0 : i32, i32
  }
  func.func @transform_6(%arg0: i32) -> (i32, i32) {
    %c0_i32 = arith.constant 0 : i32
    %c0_i32_0 = arith.constant 0 : i32
    %c0_i32_1 = arith.constant 0 : i32
    return %c0_i32, %c0_i32_0 : i32, i32
  }
  func.func @transform_7(%arg0: i32) -> (i32, i32) {
    %c0_i32 = arith.constant 0 : i32
    %c0_i32_0 = arith.constant 0 : i32
    %c0_i32_1 = arith.constant 0 : i32
    return %c0_i32, %c0_i32_0 : i32, i32
  }
  func.func @transform_8(%arg0: i32) -> (i32, i32) {
    %c0_i32 = arith.constant 0 : i32
    %c0_i32_0 = arith.constant 0 : i32
    %c0_i32_1 = arith.constant 0 : i32
    return %c0_i32, %c0_i32_0 : i32, i32
  }
  func.func @transform_9(%arg0: i32) -> (i32, i32, i32) {
    %c0_i32 = arith.constant 0 : i32
    %c0_i32_0 = arith.constant 0 : i32
    %c0_i32_1 = arith.constant 0 : i32
    return %arg0, %c0_i32, %c0_i32_0 : i32, i32, i32
  }
  func.func @transform_10(%arg0: i32) -> (i32, i32, i32) {
    %c0_i32 = arith.constant 0 : i32
    %c0_i32_0 = arith.constant 0 : i32
    %c0_i32_1 = arith.constant 0 : i32
    %c0_i32_2 = arith.constant 0 : i32
    return %c0_i32, %c0_i32_0, %c0_i32_1 : i32, i32, i32
  }
}

</mosaic_0001>

<bundles_post_ra>
// kernel: tpu_custom_call.1
= control target key start
LH: loop header
LB: loop body
LE: loop exit
PB: predicated region body
PF: predicated region fallthrough
CT: control target
= control target key end

     0   :  { %16 = vsyncpa [#allocation3], 0  ;;  %s1033_s0 = inlined_call_operand.hbm [shape: f32[1,8,32], index: 0, kind: input, shape index: {}]   ;;  %s1034_s1 = inlined_call_operand.hbm [shape: f32[2,8,32], index: 1, kind: input, shape index: {}]   ;;  %s1035_s2 = inlined_call_operand.hbm [shape: f32[2,8,32], index: 2, kind: input, shape index: {}]   ;;  %s1036_s3 = inlined_call_operand.hbm [shape: f32[32,160], index: 3, kind: input, shape index: {}]   ;;  %s1037_s4 = inlined_call_operand.hbm [shape: f32[8,160], index: 4, kind: input, shape index: {}]   ;;  %s1038_s5 = inlined_call_operand.hbm [shape: f32[32,160], index: 5, kind: input, shape index: {}]   ;;  %s1039_s6 = inlined_call_operand.hbm [shape: f32[32,192], index: 6, kind: input, shape index: {}]   ;;  %s1040_s7 = inlined_call_operand.hbm [shape: f32[32,192], index: 7, kind: input, shape index: {}]   ;;  %s1041_s8 = inlined_call_operand.vmem [shape: f32[1,192], index: 8, kind: input, shape index: {}]   ;;  %s1042_s9 = inlined_call_operand.hbm [shape: f32[1,8,128], index: 9, kind: output, shape index: {0}]   ;;  %s1043_s10 = inlined_call_operand.hbm [shape: f32[4,8,32], index: 10, kind: output, shape index: {1}]  }
   0x1   :  { %17 = vsyncpa [#allocation6], 0 }
   0x2   :  { %18 = vsyncpa [#allocation9], 0 }
   0x3   :  { %19 = vsyncpa [#allocation12], 0 }
   0x4   :  { %20 = vsyncpa [#allocation15], 0 }
   0x5   :  { %21 = vsyncpa [#allocation4], 0  ;;  %s38_s15 = sshll.u32 %s1034_s1, 4  ;;  %s39_s15 = int_to_ptr.hbm [resolvable:$true] %s38_s15 }
   0x6   :  { %22 = vsyncpa [#allocation18], 0  ;;  %s872_s16 = smov [#allocation5]   ;;  %s64_s20 = sshll.u32 %s1036_s3, 4  ;;  %s65_s20 = int_to_ptr.hbm [resolvable:$true] %s64_s20 }
   0x7   :  { %s40_s17 = sshll.u32 %s872_s16, 4  ;;  %s873_s21 = smov 128   ;;  %s41_s17 = int_to_ptr.vmem [resolvable:$true] %s40_s17 }
   0x8   :  { %s874_s22 = smov 8   ;;  %s875_s23 = smov [#allocation8]  }
   0x9   :  { %46 = dma.hbm_to_vmem [thread:$0]  %s39_s15, 256, %s41_s17, [#allocation6], %s873_s21, %s873_s21, %s874_s22  }
   0xa   :  { %s66_s24 = sshll.u32 %s875_s23, 4  ;;  %s876_s1 = smov 256   ;;  %s67_s24 = int_to_ptr.vmem [resolvable:$true] %s66_s24 }
   0xb   :  { %s877_s25 = smov 16   ;;  %s88_s3 = sshll.u32 %s1038_s5, 4  ;;  %s89_s3 = int_to_ptr.hbm [resolvable:$true] %s88_s3 }
   0xc   :  { %72 = dma.hbm_to_vmem [thread:$0]  %s65_s20, 1024, %s67_s24, [#allocation9], %s876_s1, %s876_s1, %s877_s25  }
   0xd   :  { %s878_s28 = smov [#allocation11]   ;;  %s28_s12 = sshll.u32 %s1033_s0, 4  ;;  %s29_s12 = int_to_ptr.hbm [resolvable:$true] %s28_s12 }
   0xe   :  { %s90_s29 = sshll.u32 %s878_s28, 4  ;;  %s879_s13 = smov [#allocation2]   ;;  %s91_s29 = int_to_ptr.vmem [resolvable:$true] %s90_s29 }
   0xf   :  { %96 = dma.hbm_to_vmem [thread:$0]  %s89_s3, 1024, %s91_s29, [#allocation12], %s876_s1, %s876_s1, %s877_s25  }
  0x10   :  { %s30_s14 = sshll.u32 %s879_s13, 4  ;;  %s51_s17 = sshll.u32 %s1035_s2, 4  ;;  %s31_s14 = int_to_ptr.vmem [resolvable:$true] %s30_s14  ;;  %s52_s17 = int_to_ptr.hbm [resolvable:$true] %s51_s17 }
  0x11   :  { %33 = dma.hbm_to_vmem [thread:$0]  %s29_s12, 128, %s31_s14, [#allocation3]  }
  0x12   :  { %s78_s19 = sshll.u32 %s1037_s4, 4  ;;  %s880_s20 = smov [#allocation7]   ;;  %s79_s19 = int_to_ptr.hbm [resolvable:$true] %s78_s19 }
  0x13   :  { %s53_s0 = sshll.u32 %s880_s20, 4  ;;  %s881_s23 = smov [#allocation10]   ;;  %s54_s0 = int_to_ptr.vmem [resolvable:$true] %s53_s0 }
  0x14   :  { %59 = dma.hbm_to_vmem [thread:$0]  %s52_s17, 256, %s54_s0, [#allocation6], %s873_s21, %s873_s21, %s874_s22  }
  0x15   :  { %s80_s24 = sshll.u32 %s881_s23, 4  ;;  %s101_s2 = sshll.u32 %s1039_s6, 4  ;;  %s81_s24 = int_to_ptr.vmem [resolvable:$true] %s80_s24  ;;  %s102_s2 = int_to_ptr.hbm [resolvable:$true] %s101_s2 }
  0x16   :  { %83 = dma.hbm_to_vmem [thread:$0]  %s79_s19, 256, %s81_s24, [#allocation9]  }
  0x17   :  { %s114_s4 = sshll.u32 %s1040_s7, 4  ;;  %s882_s29 = smov [#allocation13]   ;;  %s115_s4 = int_to_ptr.hbm [resolvable:$true] %s114_s4 }
  0x18   :  { %s103_s30 = sshll.u32 %s882_s29, 4  ;;  %s883_s11 = smov [#allocation14]   ;;  %s104_s30 = int_to_ptr.vmem [resolvable:$true] %s103_s30 }
  0x19   :  { %109 = dma.hbm_to_vmem [thread:$0]  %s102_s2, 1024, %s104_s30, [#allocation12], %s876_s1, %s876_s1, %s877_s25  }
  0x1a   :  { %s116_s12 = sshll.u32 %s883_s11, 4  ;;  %s117_s12 = int_to_ptr.vmem [resolvable:$true] %s116_s12 }
  0x1b   :  { %122 = dma.hbm_to_vmem [thread:$0]  %s115_s4, 1024, %s117_s12, [#allocation15], %s876_s1, %s876_s1, %s877_s25  }
  0x1c   :  { %858 = dma.done.wait [#allocation3], 128  }
  0x1d   :  { %859 = vsyncadd [#allocation3], 4294967168 }
  0x1e   :  { %860 = dma.done.wait [#allocation6], 512  }
  0x1f   :  { %861 = vsyncadd [#allocation6], 4294966784 }
  0x20   :  { %862 = dma.done.wait [#allocation9], 1280  }
  0x21   :  { %863 = vsyncadd [#allocation9], 4294966016 }
  0x22   :  { %864 = dma.done.wait [#allocation12], 2048  }
  0x23   :  { %865 = vsyncadd [#allocation12], 4294965248 }
  0x24   :  { %866 = dma.done.wait [#allocation15], 1024  }
  0x25   :  { %867 = vsyncadd [#allocation15], 4294966272  ;;  %v245_v0 = vld [vmem:[#allocation11 + $0x38] sm:$0xff]  ;;  %v243_v1 = vld [vmem:[#allocation11 + $0x28] sm:$0xff]  ;;  %vm162_vm0 = vcmask 261120   ;;  %s884_s6 = smov 32  }
  0x26   :  { %v183_v2 = vld [vmem:[#allocation8 + $0x38] sm:$0xff]  ;;  %304 = vmatpush.msra.mxu3 %v245_v0  ;;  %v181_v3 = vld [vmem:[#allocation8 + $0x28] sm:$0xff]  ;;  %v161_v5 = vld [vmem:[#allocation5] sm:$0xff]  ;;  %s885_s7 = smov 96   ;;  %s886_s1 = smov 64   ;;  %vm519_vm13 = vcmask 523264  }
  0x27   :  { %220 = vmatpush.msra.mxu1 %v183_v2  ;;  %v241_v4 = vld [vmem:[#allocation11 + $0x18] sm:$0xff]  ;;  %v179_v6 = vld [vmem:[#allocation8 + $0x18] sm:$0xff]  ;;  %163 = vst.msk [vmem:[#allocation17] sm:$0xff] %vm162_vm0, %v161_v5  ;;  %v244_v7 = vld [vmem:[#allocation11 + $0x30] sm:$0xff]  ;;  %s552_s17 = sshll.u32 %s1043_s10, 4  ;;  %s888_s5 = smov [#allocation16]   ;;  %s553_s17 = int_to_ptr.hbm [resolvable:$true] %s552_s17 }
  0x28   :  { %305 = vmatpush.msra.mxu3 %v243_v1  ;;  %v242_v8 = vld [vmem:[#allocation11 + $0x20] sm:$0xff]  ;;  %v239_v9 = vld [vmem:[#allocation11 + $0x8] sm:$0xff]  ;;  %v177_v10 = vld [vmem:[#allocation8 + $0x8] sm:$0xff]  ;;  %284 = vmatpush.msra.mxu2 %v244_v7  ;;  %s540_s18 = sshll.u32 %s888_s5, 4  ;;  %s542_s0 = sshll.u32 %s1042_s9, 4  ;;  %s541_s18 = int_to_ptr.vmem [resolvable:$true] %s540_s18  ;;  %s543_s0 = int_to_ptr.hbm [resolvable:$true] %s542_s0 }
  0x29   :  { %221 = vmatpush.msra.mxu1 %v181_v3  ;;  %v182_v11 = vld [vmem:[#allocation8 + $0x30] sm:$0xff]  ;;  %v175_v12 = vld [vmem:[#allocation2] sm:$0xff]  ;;  %v240_v13 = vld [vmem:[#allocation11 + $0x10] sm:$0xff] }
  0x2a   :  { %306 = vmatpush.msra.mxu3 %v241_v4  ;;  %285 = vmatpush.msra.mxu2 %v242_v8  ;;  %v180_v14 = vld [vmem:[#allocation8 + $0x20] sm:$0xff]  ;;  %v238_v15 = vld [vmem:[#allocation11] sm:$0xff]  ;;  %v229_v22 = vld [vmem:[#allocation10 + $0x8] sm:$0xff] }
  0x2b   :  { %222 = vmatpush.msra.mxu1 %v179_v6  ;;  %200 = vmatpush.msra.mxu0 %v182_v11  ;;  %v178_v16 = vld [vmem:[#allocation8 + $0x10] sm:$0xff]  ;;  %v176_v18 = vld [vmem:[#allocation8] sm:$0xff]  ;;  %v253_v53 = vld [vmem:[#allocation13 + $0x38] sm:$0xff] }
  0x2c   :  { %307 = vmatpush.msra.mxu3 %v239_v9  ;;  %286 = vmatpush.msra.mxu2 %v240_v13  ;;  %v168_v19 = vld [vmem:[#allocation7] sm:$0xff]  ;;  %v228_v27 = vld [vmem:[#allocation10] sm:$0xff]  ;;  %v251_v55 = vld [vmem:[#allocation13 + $0x28] sm:$0xff] }
  0x2d   :  { %223 = vmatpush.msra.mxu1 %v177_v10  ;;  %201 = vmatpush.msra.mxu0 %v180_v14  ;;  %170 = vst.msk [vmem:[#allocation17 + $0x10] sm:$0xff] %vm162_vm0, %v168_v19  ;;  %v252_v54 = vld [vmem:[#allocation13 + $0x30] sm:$0xff]  ;;  %v250_v56 = vld [vmem:[#allocation13 + $0x20] sm:$0xff]  ;;  %v249_v57 = vld [vmem:[#allocation13 + $0x18] sm:$0xff] }
  0x2e   :  { %575 = vmatmul.msk.f32.vlgmr.msra.gmra.mxu1 %vm162_vm0, %v175_v12  ;;  %v262_v17 = vld [vmem:[#allocation17] sm:$0xff]  ;;  %287 = vmatpush.msra.mxu2 %v238_v15  ;;  %v248_v58 = vld [vmem:[#allocation13 + $0x10] sm:$0xff]  ;;  %v261_v59 = vld [vmem:[#allocation14 + $0x38] sm:$0xff] }
  0x2f   :  { %577 = vmatmul.msk.f32.vlgmr.msra.gmra.mxu3 %vm162_vm0, %v262_v17  ;;  %576 = vmatmul.msk.f32.vlgmr.msra.gmra.mxu2 %vm162_vm0, %v262_v17  ;;  %v260_v60 = vld [vmem:[#allocation14 + $0x30] sm:$0xff]  ;;  %v247_v61 = vld [vmem:[#allocation13 + $0x8] sm:$0xff]  ;;  %v246_v62 = vld [vmem:[#allocation13] sm:$0xff] }
  0x30   :  { %202 = vmatpush.msra.mxu0 %v178_v16  ;;  %439 = vmatpush.msrb.mxu3 %v253_v53  ;;  %v165_v1 = vld [vmem:[#allocation5 + $0x8] sm:$0xff]  ;;  %v259_v2 = vld [vmem:[#allocation14 + $0x28] sm:$0xff]  ;;  %v258_v3 = vld [vmem:[#allocation14 + $0x20] sm:$0xff] }
  0x31   :  { %419 = vmatpush.msrb.mxu2 %v252_v54  ;;  %394 = vmatpush.msrb.mxu1 %v261_v59  ;;  %167 = vst.msk [vmem:[#allocation17 + $0x8] sm:$0xff] %vm162_vm0, %v165_v1  ;;  %v257_v4 = vld [vmem:[#allocation14 + $0x18] sm:$0xff]  ;;  %v256_v5 = vld [vmem:[#allocation14 + $0x10] sm:$0xff]  ;;  %v255_v6 = vld [vmem:[#allocation14 + $0x8] sm:$0xff] }
  0x32   :  { %203 = vmatpush.msra.mxu0 %v176_v18  ;;  %440 = vmatpush.msrb.mxu3 %v251_v55  ;;  %v254_v7 = vld [vmem:[#allocation14] sm:$0xff]  ;;  %v172_v8 = vld [vmem:[#allocation7 + $0x8] sm:$0xff] }
  0x33   :  { %574 = vmatmul.msk.f32.vlgmr.msra.gmra.mxu0 %vm162_vm0, %v175_v12  ;;  %420 = vmatpush.msrb.mxu2 %v250_v56  ;;  %174 = vst.msk [vmem:[#allocation17 + $0x18] sm:$0xff] %vm162_vm0, %v172_v8  ;;  %v232_v12 = vld [vmem:[%s1041_s8] sm:$0x3]  ;;  %s887_s8 = smov [#allocation17]  }
  0x34   :  { %v266_v20 = vld [vmem:[#allocation17 + $0x10] sm:$0xff]  ;;  %374 = vmatpush.msrb.mxu0 %v260_v60  ;;  %441 = vmatpush.msrb.mxu3 %v249_v57  ;;  %v235_v14 = vperm.slane %v232_v12, 1  ;;  %s550_s14 = sshll.u32 %s887_s8, 4  ;;  %s551_s14 = int_to_ptr.vmem [resolvable:$true] %s550_s14 }
  0x35   :  { %339 = vrot.lane.b32.xlu1 %v266_v20, %s884_s6  ;;  %421 = vmatpush.msrb.mxu2 %v248_v58  ;;  %v234_v20 = vperm.slane %v232_v12, 0 }
  0x36   :  { %442 = vmatpush.msrb.mxu3 %v247_v61  ;;  %395 = vmatpush.msrb.mxu1 %v259_v2 }
  0x37   :  { %422 = vmatpush.msrb.mxu2 %v246_v62  ;;  %375 = vmatpush.msrb.mxu0 %v258_v3 }
  0x38   :  { %396 = vmatpush.msrb.mxu1 %v257_v4  ;;  %v264_v9 = vld [vmem:[#allocation17 + $0x8] sm:$0xff] }
  0x39   :  { %376 = vmatpush.msrb.mxu0 %v256_v5 }
  0x3a   :  { %397 = vmatpush.msrb.mxu1 %v255_v6  ;;  %v268_v10 = vld [vmem:[#allocation17 + $0x18] sm:$0xff] }
  0x3b   :  { %377 = vmatpush.msrb.mxu0 %v254_v7  ;;  %580 = vmatmul.msk.f32.vlgmr.msrb.gmra.mxu1 %vm162_vm0, %v264_v9 }
  0x3c   :  { %579 = vmatmul.msk.f32.vlgmr.msrb.gmra.mxu0 %vm162_vm0, %v264_v9 }
  0xa7   :  { %v340_v48 = vpop.permute.xlu1 %339 }
  0xab   :  { %v225_v21 = vpop.f32.mrf.mxu1 }
  0xac   :  { %v231_v23 = vadd.f32 %v229_v22, %v225_v21 }
  0xb0   :  { %v205_v26 = vpop.f32.mrf.mxu0 }
  0xb1   :  { %v230_v28 = vadd.f32 %v228_v27, %v205_v26 }
  0xb2   :  { %v309_v24 = vpop.f32.mrf.mxu3  ;;  %v289_v29 = vpop.f32.mrf.mxu2 }
  0xb3   :  { %v313_v25 = vadd.f32 %v309_v24, %v231_v23  ;;  %v312_v30 = vadd.f32 %v289_v29, %v230_v28 }
  0xb5   :  { %334 = vrot.lane.b32.xlu0 %v313_v25, %s885_s7  ;;  %v578_v33 = vmul.f32 -1.442695, %v312_v30 }
  0xb7   :  { %602 = vpow2.f32 %v578_v33 }
  0xb8   :  { %v399_v13 = vpop.f32.mrf.mxu1 }
  0xb9   :  { %v379_v18 = vpop.f32.mrf.mxu0 }
  0xbd   :  { %v603_v34 = vpop.eup %602 }
  0xbe   :  { %v317_v35 = vadd.f32 1.0, %v603_v34 }
  0xc0   :  { %604 = vrcp.f32 %v317_v35  ;;  %vm323_vm1 = vweird.f32 %v317_v35  ;;  %v329_v40 = vand.u32 2147483648, %v317_v35  ;;  %v327_v42 = vand.u32 2147483647, %v317_v35 }
  0xc2   :  { %v330_v43 = vor.u32 1.1754944e-38, %v329_v40  ;;  %vm328_vm4 = vcmp.eq.f32.partialorder %v327_v42, 8.507059e+37 }
  0xc6   :  { %v605_v36 = vpop.eup %604 }
  0xc7   :  { %v319_v37 = vmul.f32 %v605_v36, %v317_v35  ;;  %vm324_vm2 = vweird.f32 %v605_v36 }
  0xc8   :  { %vm325_vm3 = vmor %vm323_vm1, %vm324_vm2 }
  0xc9   :  { %v320_v38 = vsub.f32 1.0, %v319_v37 }
  0xcb   :  { %v321_v39 = vmul.f32 %v605_v36, %v320_v38 }
  0xcd   :  { %v322_v41 = vadd.f32 %v605_v36, %v321_v39 }
  0xcf   :  { %v326_v44 = vsel %vm325_vm3, %v605_v36, %v322_v41 }
  0xd0   :  { %v331_v45 = vsel %vm328_vm4, %v330_v43, %v326_v44 }
  0xd1   :  { %v342_v49 = vmul.f32 %v340_v48, %v331_v45 }
 0x127   :  { %v335_v31 = vpop.permute.xlu0 %334 }
 0x128   :  { %v337_v32 = vmax.f32 %v312_v30, %v335_v31 }
 0x12a   :  { %344 = vrot.lane.b32.xlu0 %v337_v32, %s884_s6 }
 0x19c   :  { %v345_v46 = vpop.permute.xlu0 %344 }
 0x19d   :  { %v347_v47 = vmul.f32 %v345_v46, %v331_v45 }
 0x19f   :  { %349 = vrot.lane.b32.xlu1 %v347_v47, %s884_s6 }
 0x211   :  { %v350_v50 = vpop.permute.xlu1 %349 }
 0x212   :  { %v996_v51 = vadd.f32 %v350_v50, %v342_v49 }
 0x214   :  { %606 = vtanh.f32 %v996_v51 }
 0x21a   :  { %v607_v52 = vpop.eup %606 }
 0x21b   :  { %355 = vrot.lane.b32.xlu2 %v607_v52, %s884_s6 }
 0x275   :  { %v356_v63 = vpop.permute.xlu2 %355 }
 0x276   :  { %v358_v0 = vmul.f32 %v356_v63, %v331_v45 }
 0x278   :  { %403 = vrot.lane.b32.xlu2 %v358_v0, %s886_s1 }
 0x280   :  { %474 = vrot.lane.b32.xlu2 %v268_v10, %s884_s6 }
 0x2d2   :  { %v404_v11 = vpop.permute.xlu2 %403 }
 0x2d3   :  { %523 = vst.msk [vmem:[#allocation17] sm:$0xff] %vm162_vm0, %v404_v11  ;;  %581 = vmatmul.msk.f32.vlgmr.msrb.gmra.mxu2 %vm162_vm0, %v404_v11  ;;  %582 = vmatmul.msk.f32.vlgmr.msrb.gmra.mxu3 %vm162_vm0, %v404_v11 }
 0x2da   :  { %v475_v46 = vpop.permute.xlu2 %474 }
 0x356   :  { %v444_v15 = vpop.f32.mrf.mxu3  ;;  %v424_v19 = vpop.f32.mrf.mxu2 }
 0x357   :  { %v445_v16 = vadd.f32 %v444_v15, %v399_v13  ;;  %v425_v21 = vadd.f32 %v424_v19, %v379_v18 }
 0x359   :  { %v448_v17 = vadd.f32 %v445_v16, %v235_v14  ;;  %v447_v22 = vadd.f32 %v425_v21, %v234_v20 }
 0x35b   :  { %469 = vrot.lane.b32.xlu0 %v448_v17, %s885_s7  ;;  %v583_v25 = vmul.f32 -1.442695, %v447_v22  ;;  %v584_v40 = vmul.f32 -1.442695, %v448_v17 }
 0x35d   :  { %608 = vpow2.f32 %v583_v25 }
 0x363   :  { %v609_v26 = vpop.eup %608 }
 0x364   :  { %v452_v27 = vadd.f32 1.0, %v609_v26 }
 0x366   :  { %610 = vrcp.f32 %v452_v27  ;;  %v464_v33 = vand.u32 2147483648, %v452_v27  ;;  %vm458_vm6 = vweird.f32 %v452_v27  ;;  %v462_v34 = vand.u32 2147483647, %v452_v27 }
 0x367   :  { %612 = vpow2.f32 %v584_v40 }
 0x368   :  { %v465_v36 = vor.u32 1.1754944e-38, %v464_v33  ;;  %vm463_vm8 = vcmp.eq.f32.partialorder %v462_v34, 8.507059e+37 }
 0x36c   :  { %v611_v28 = vpop.eup %610 }
 0x36d   :  { %v454_v29 = vmul.f32 %v611_v28, %v452_v27  ;;  %vm459_vm5 = vweird.f32 %v611_v28  ;;  %v613_v41 = vpop.eup %612 }
 0x36e   :  { %vm460_vm7 = vmor %vm458_vm6, %vm459_vm5  ;;  %v492_v42 = vadd.f32 1.0, %v613_v41 }
 0x36f   :  { %v455_v30 = vsub.f32 1.0, %v454_v29 }
 0x370   :  { %614 = vrcp.f32 %v492_v42  ;;  %v504_v53 = vand.u32 2147483648, %v492_v42  ;;  %vm498_vm10 = vweird.f32 %v492_v42  ;;  %v502_v54 = vand.u32 2147483647, %v492_v42 }
 0x371   :  { %v456_v31 = vmul.f32 %v611_v28, %v455_v30 }
 0x372   :  { %v505_v55 = vor.u32 1.1754944e-38, %v504_v53  ;;  %vm503_vm12 = vcmp.eq.f32.partialorder %v502_v54, 8.507059e+37 }
 0x373   :  { %v457_v32 = vadd.f32 %v611_v28, %v456_v31 }
 0x375   :  { %v461_v35 = vsel %vm460_vm7, %v611_v28, %v457_v32 }
 0x376   :  { %v466_v37 = vsel %vm463_vm8, %v465_v36, %v461_v35  ;;  %v615_v43 = vpop.eup %614 }
 0x377   :  { %v494_v44 = vmul.f32 %v615_v43, %v492_v42  ;;  %v477_v48 = vmul.f32 %v475_v46, %v466_v37  ;;  %vm499_vm9 = vweird.f32 %v615_v43 }
 0x378   :  { %vm500_vm11 = vmor %vm498_vm10, %vm499_vm9 }
 0x379   :  { %v495_v45 = vsub.f32 1.0, %v494_v44 }
 0x37b   :  { %v496_v47 = vmul.f32 %v615_v43, %v495_v45 }
 0x37d   :  { %v497_v52 = vadd.f32 %v615_v43, %v496_v47 }
 0x3cd   :  { %v470_v23 = vpop.permute.xlu0 %469 }
 0x3ce   :  { %v472_v24 = vmax.f32 %v447_v22, %v470_v23 }
 0x3d0   :  { %479 = vrot.lane.b32.xlu1 %v472_v24, %s884_s6 }
 0x442   :  { %v480_v38 = vpop.permute.xlu1 %479 }
 0x443   :  { %v482_v39 = vmul.f32 %v480_v38, %v466_v37 }
 0x445   :  { %484 = vrot.lane.b32.xlu0 %v482_v39, %s884_s6 }
 0x44d   :  { %526 = vrot.lane.b32.xlu0 %v996_v51, %s885_s7  ;;  %v501_v51 = vsel %vm500_vm11, %v615_v43, %v497_v52 }
 0x44e   :  { %v506_v58 = vsel %vm503_vm12, %v505_v55, %v501_v51 }
 0x4b7   :  { %v485_v49 = vpop.permute.xlu0 %484 }
 0x4b8   :  { %v487_v50 = vadd.f32 %v485_v49, %v477_v48 }
 0x4ba   :  { %616 = vtanh.f32 %v487_v50 }
 0x4bf   :  { %v527_v56 = vpop.permute.xlu0 %526 }
 0x4c0   :  { %v617_v57 = vpop.eup %616  ;;  %529 = vst.msk [vmem:[#allocation17 + $0x10] sm:$0xff] %vm162_vm0, %v527_v56 }
 0x4c1   :  { %510 = vrot.lane.b32.xlu1 %v617_v57, %s884_s6  ;;  %v508_v59 = vmul.f32 %v617_v57, %v506_v58 }
 0x4c9   :  { %531 = vrot.lane.b32.xlu1 %v487_v50, %s885_s7 }
 0x533   :  { %v511_v60 = vpop.permute.xlu1 %510 }
 0x534   :  { %v513_v61 = vmul.f32 %v511_v60, %v466_v37 }
 0x536   :  { %515 = vrot.lane.b32.xlu2 %v513_v61, %s886_s1 }
 0x53b   :  { %v532_v62 = vpop.permute.xlu1 %531 }
 0x53c   :  { %534 = vst.msk [vmem:[#allocation17 + $0x18] sm:$0xff] %vm162_vm0, %v532_v62 }
 0x590   :  { %v516_v63 = vpop.permute.xlu2 %515 }
 0x591   :  { %v518_v0 = vsel %vm162_vm0, %v516_v63, %v508_v59  ;;  %524 = vst.msk [vmem:[#allocation17 + $0x8] sm:$0xff] %vm162_vm0, %v516_v63 }
 0x592   :  { %v520_v1 = vsel %vm519_vm13, %v518_v0, 0.0  ;;  %558 = dma.vmem_to_hbm [thread:$0]  %s551_s14, 512, %s553_s17, [#allocation18], %s873_s21, %s873_s21, %s874_s22  }
 0x593   :  { %521 = vst [vmem:[#allocation16] sm:$0xff] %v520_v1 }
 0x594   :  { %545 = dma.vmem_to_hbm [thread:$0]  %s541_s18, 128, %s543_s0, [#allocation4]  }
 0x595   :  { %868 = dma.done.wait [#allocation4], 128  }
 0x596   :  { %869 = vsyncadd [#allocation4], 4294967168 }
 0x597   :  { %870 = dma.done.wait [#allocation18], 512  }
 0x598   :  { %871 = vsyncadd [#allocation18], 4294966784 }
 0x599   :  { %567 = vsyncpa [#allocation3], 1 }
 0x59a   :  { %568 = vsyncpa [#allocation6], 1 }
 0x59b   :  { %569 = vsyncpa [#allocation9], 1 }
 0x59c   :  { %570 = vsyncpa [#allocation12], 1 }
 0x59d   :  { %571 = vsyncpa [#allocation15], 1 }
 0x59e   :  { %572 = vsyncpa [#allocation4], 1 }
 0x59f   :  { %573 = vsyncpa [#allocation18], 1 }

</bundles_post_ra>
